<compile_context>
chip_gen: v7x
topology: tpu7x:2x2x1
jax: 0.10.0
libtpu: 0.0.40
codegen_flags: <defaults>
</compile_context>

<pallas_src>
import jax
import jax.numpy as jnp
from jax import lax
from jax.experimental import pallas as pl
from jax.experimental.pallas import tpu as pltpu

_LN_EPS = 1e-5  # torch.nn.LayerNorm default


def _patch_merging_kernel(x_ref, gamma_ref, beta_ref, w_ref, o_ref):
    """One row tile: out = LayerNorm(x; gamma, beta) @ W.

    x_ref     : (TM, 4C)  merged 2x2 patches (lane-dense last dim)
    gamma_ref : (1, 4C)   LayerNorm weight
    beta_ref  : (1, 4C)   LayerNorm bias
    w_ref     : (4C, 2C)  reduction weight (in x out)
    o_ref     : (TM, 2C)
    """
    x = x_ref[...].astype(jnp.float32)

    # LayerNorm over the last (4C) axis, f32 math.
    mean = jnp.mean(x, axis=-1, keepdims=True)
    xc = x - mean
    var = jnp.mean(xc * xc, axis=-1, keepdims=True)
    inv = lax.rsqrt(var + _LN_EPS)                      # EUP, co-issues
    y = xc * inv * gamma_ref[...].astype(jnp.float32) \
        + beta_ref[...].astype(jnp.float32)

    # TODO(synk): at production channel counts cast y / w to bf16 here for
    # v6e/v7x MXU peak (keep preferred_element_type=f32); kept f32 so the
    # small-shape test matches the f32 reference tightly.
    o_ref[...] = jnp.dot(y, w_ref[...].astype(jnp.float32),
                         preferred_element_type=jnp.float32).astype(o_ref.dtype)


def patch_merging(x, gamma, beta, w_reduction, *, input_resolution,
                  row_tile=256):
    """PatchMerging forward. x: (B, H*W, C); returns (B, H/2*W/2, 2C)."""
    H, W = input_resolution
    B, L, C = x.shape
    assert L == H * W, "input feature has wrong size"
    assert H % 2 == 0 and W % 2 == 0, f"x size ({H}*{W}) are not even."

    # ---- 2x2 space-to-depth matching torch.cat([x0, x1, x2, x3], -1) ----
    # merged[b, hh, ww, wp*2C + hp*C + c] = x[b, 2*hh + hp, 2*ww + wp, c]
    xr = x.reshape(B, H // 2, 2, W // 2, 2, C)       # (b, hh, hp, ww, wp, c)
    xr = jnp.transpose(xr, (0, 1, 3, 4, 2, 5))       # (b, hh, ww, wp, hp, c)
    rows = B * (H // 2) * (W // 2)
    xm = xr.reshape(rows, 4 * C)                     # lane-dense slab

    # torch nn.Linear stores weight as (out=2C, in=4C); kernel wants (4C, 2C).
    w = jnp.transpose(w_reduction, (1, 0))
    gamma2 = gamma.reshape(1, 4 * C)
    beta2 = beta.reshape(1, 4 * C)

    # Row tiling: one "parallel" grid axis; whole problem in one step if small.
    tm = min(row_tile, rows)
    rows_p = ((rows + tm - 1) // tm) * tm
    if rows_p != rows:
        xm = jnp.pad(xm, ((0, rows_p - rows), (0, 0)))

    out = pl.pallas_call(
        _patch_merging_kernel,
        out_shape=jax.ShapeDtypeStruct((rows_p, 2 * C), x.dtype),
        grid=(rows_p // tm,),
        in_specs=[
            pl.BlockSpec((tm, 4 * C), lambda i: (i, 0)),      # merged patches
            pl.BlockSpec((1, 4 * C), lambda i: (0, 0)),       # gamma
            pl.BlockSpec((1, 4 * C), lambda i: (0, 0)),       # beta
            pl.BlockSpec((4 * C, 2 * C), lambda i: (0, 0)),   # reduction W
        ],
        out_specs=pl.BlockSpec((tm, 2 * C), lambda i: (i, 0)),
        compiler_params=pltpu.CompilerParams(
            dimension_semantics=("parallel",)),
    )(xm, gamma2, beta2, w)

    out = out[:rows]
    return out.reshape(B, (H // 2) * (W // 2), 2 * C)


def _reference(x, gamma, beta, w_reduction, *, input_resolution):
    """Pure-JAX reference matching the PyTorch module exactly."""
    H, W = input_resolution
    B, L, C = x.shape
    xv = x.reshape(B, H, W, C)
    x0 = xv[:, 0::2, 0::2, :]
    x1 = xv[:, 1::2, 0::2, :]
    x2 = xv[:, 0::2, 1::2, :]
    x3 = xv[:, 1::2, 1::2, :]
    xm = jnp.concatenate([x0, x1, x2, x3], -1).reshape(B, -1, 4 * C)
    mean = jnp.mean(xm, axis=-1, keepdims=True)
    var = jnp.mean((xm - mean) ** 2, axis=-1, keepdims=True)
    xn = (xm - mean) / jnp.sqrt(var + _LN_EPS) * gamma + beta
    return xn @ w_reduction.T


if __name__ == "__main__":
    B, C = 2, 32          # dim = 32 -> 4*dim = 128 (lane-dense), 2*dim = 64
    H = W = 16            # input_resolution = (16, 16) -> L = 256

    key = jax.random.PRNGKey(0)
    kx, kg, kb, kw = jax.random.split(key, 4)

    x = jax.random.normal(kx, (B, H * W, C), jnp.float32)
    gamma = 1.0 + 0.1 * jax.random.normal(kg, (4 * C,), jnp.float32)
    beta = 0.1 * jax.random.normal(kb, (4 * C,), jnp.float32)
    # nn.Linear(4*dim, 2*dim, bias=False).weight has shape (2*dim, 4*dim)
    w_red = jax.random.normal(kw, (2 * C, 4 * C), jnp.float32) / jnp.sqrt(4.0 * C)

    out = jax.block_until_ready(
        patch_merging(x, gamma, beta, w_red, input_resolution=(H, W)))
    ref = jax.block_until_ready(
        _reference(x, gamma, beta, w_red, input_resolution=(H, W)))

    assert out.shape == ref.shape == (B, (H // 2) * (W // 2), 2 * C)
    err = jnp.max(jnp.abs(out - ref))
    assert jnp.allclose(out, ref, atol=1e-4, rtol=1e-4), f"max abs err {err}"

    print("KERNEL_OK")
</pallas_src>

<mosaic_0001>
module attributes {stable_mosaic.version = 11 : i64} {
  func.func @_patch_merging_kernel(%arg0: i32, %arg1: memref<128x128xf32, #tpu.memory_space<vmem>>, %arg2: memref<1x128xf32, #tpu.memory_space<vmem>>, %arg3: memref<1x128xf32, #tpu.memory_space<vmem>>, %arg4: memref<128x64xf32, #tpu.memory_space<vmem>>, %arg5: memref<128x64xf32, #tpu.memory_space<vmem>>) attributes {dimension_semantics = [#tpu.dimension_semantics<parallel>], iteration_bounds = array<i64: 1>, scalar_prefetch = 0 : i64, scratch_operands = 0 : i64, tpu.core_type = #tpu.core_type<tc>, window_params = [{transform_indices = @transform_0, window_bounds = array<i64: 128, 128>}, {pipeline_mode = #tpu.pipeline_mode<synchronous>, transform_indices = @transform_1, window_bounds = array<i64: 1, 128>}, {pipeline_mode = #tpu.pipeline_mode<synchronous>, transform_indices = @transform_2, window_bounds = array<i64: 1, 128>}, {pipeline_mode = #tpu.pipeline_mode<synchronous>, transform_indices = @transform_3, window_bounds = array<i64: 128, 64>}, {transform_indices = @transform_4, window_bounds = array<i64: 128, 64>}]} {
    %c0 = arith.constant 0 : index
    %c0_0 = arith.constant 0 : index
    %0 = vector.load %arg1[%c0, %c0_0] : memref<128x128xf32, #tpu.memory_space<vmem>>, vector<128x128xf32>
    %cst = arith.constant dense<0.000000e+00> : vector<128xf32>
    %1 = vector.multi_reduction <add>, %0, %cst [1] : vector<128x128xf32> to vector<128xf32>
    %2 = vector.shape_cast %1 : vector<128xf32> to vector<128x1xf32>
    %cst_1 = arith.constant 1.280000e+02 : f32
    %3 = vector.broadcast %cst_1 : f32 to vector<128x1xf32>
    %4 = arith.divf %2, %3 : vector<128x1xf32>
    %5 = vector.broadcast %4 : vector<128x1xf32> to vector<128x128xf32>
    %6 = arith.subf %0, %5 : vector<128x128xf32>
    %7 = arith.mulf %6, %6 : vector<128x128xf32>
    %cst_2 = arith.constant dense<0.000000e+00> : vector<128xf32>
    %8 = vector.multi_reduction <add>, %7, %cst_2 [1] : vector<128x128xf32> to vector<128xf32>
    %9 = vector.shape_cast %8 : vector<128xf32> to vector<128x1xf32>
    %cst_3 = arith.constant 1.280000e+02 : f32
    %10 = vector.broadcast %cst_3 : f32 to vector<128x1xf32>
    %11 = arith.divf %9, %10 : vector<128x1xf32>
    %cst_4 = arith.constant 9.99999974E-6 : f32
    %12 = vector.broadcast %cst_4 : f32 to vector<128x1xf32>
    %13 = arith.addf %11, %12 : vector<128x1xf32>
    %14 = math.rsqrt %13 : vector<128x1xf32>
    %15 = vector.broadcast %14 : vector<128x1xf32> to vector<128x128xf32>
    %16 = arith.mulf %6, %15 : vector<128x128xf32>
    %c0_5 = arith.constant 0 : index
    %c0_6 = arith.constant 0 : index
    %17 = vector.load %arg2[%c0_5, %c0_6] : memref<1x128xf32, #tpu.memory_space<vmem>>, vector<1x128xf32>
    %18 = vector.broadcast %17 : vector<1x128xf32> to vector<128x128xf32>
    %19 = arith.mulf %16, %18 : vector<128x128xf32>
    %c0_7 = arith.constant 0 : index
    %c0_8 = arith.constant 0 : index
    %20 = vector.load %arg3[%c0_7, %c0_8] : memref<1x128xf32, #tpu.memory_space<vmem>>, vector<1x128xf32>
    %21 = vector.broadcast %20 : vector<1x128xf32> to vector<128x128xf32>
    %22 = arith.addf %19, %21 : vector<128x128xf32>
    %c0_9 = arith.constant 0 : index
    %c0_10 = arith.constant 0 : index
    %23 = vector.load %arg4[%c0_9, %c0_10] : memref<128x64xf32, #tpu.memory_space<vmem>>, vector<128x64xf32>
    %cst_11 = arith.constant dense<0.000000e+00> : vector<128x64xf32>
    %24 = tpu.matmul %22, %23, %cst_11 {dimension_numbers = #tpu.dot_dimension_numbers<[1], [0], [0], [1], [0, 0, 1, 1], [], []>} : vector<128x128xf32>, vector<128x64xf32>, vector<128x64xf32> -> vector<128x64xf32>
    %c0_12 = arith.constant 0 : index
    %c0_13 = arith.constant 0 : index
    %25 = vector.load %arg5[%c0_12, %c0_13] : memref<128x64xf32, #tpu.memory_space<vmem>>, vector<128x64xf32>
    tpu.vector_store %arg5[%c0_12, %c0_13], %24 {strides = array<i32>} : memref<128x64xf32, #tpu.memory_space<vmem>>, vector<128x64xf32>,
    return
  }
  func.func @transform_0(%arg0: i32) -> (i32, i32) {
    %c0_i32 = arith.constant 0 : i32
    %c0_i32_0 = arith.constant 0 : i32
    return %arg0, %c0_i32 : i32, i32
  }
  func.func @transform_1(%arg0: i32) -> (i32, i32) {
    %c0_i32 = arith.constant 0 : i32
    %c0_i32_0 = arith.constant 0 : i32
    %c0_i32_1 = arith.constant 0 : i32
    return %c0_i32, %c0_i32_0 : i32, i32
  }
  func.func @transform_2(%arg0: i32) -> (i32, i32) {
    %c0_i32 = arith.constant 0 : i32
    %c0_i32_0 = arith.constant 0 : i32
    %c0_i32_1 = arith.constant 0 : i32
    return %c0_i32, %c0_i32_0 : i32, i32
  }
  func.func @transform_3(%arg0: i32) -> (i32, i32) {
    %c0_i32 = arith.constant 0 : i32
    %c0_i32_0 = arith.constant 0 : i32
    %c0_i32_1 = arith.constant 0 : i32
    return %c0_i32, %c0_i32_0 : i32, i32
  }
  func.func @transform_4(%arg0: i32) -> (i32, i32) {
    %c0_i32 = arith.constant 0 : i32
    %c0_i32_0 = arith.constant 0 : i32
    return %arg0, %c0_i32 : i32, i32
  }
}

</mosaic_0001>

<bundles_post_ra>
// kernel: tpu_custom_call.1
= control target key start
LH: loop header
LB: loop body
LE: loop exit
PB: predicated region body
PF: predicated region fallthrough
CT: control target
= control target key end

     0   :  { %vm417_vm0 = vcmask 523264   ;;  %s955_s0 = inlined_call_operand.vmem [shape: f32[128,128], index: 0, kind: input, shape index: {}]   ;;  %s956_s3 = inlined_call_operand.vmem [shape: f32[128,64], index: 3, kind: input, shape index: {}]   ;;  %s957_s1 = inlined_call_operand.vmem [shape: f32[1,128], index: 1, kind: input, shape index: {}]   ;;  %s958_s2 = inlined_call_operand.vmem [shape: f32[1,128], index: 2, kind: input, shape index: {}]   ;;  %s959_s4 = inlined_call_operand.vmem [shape: f32[128,64], index: 4, kind: output, shape index: {}]  }
   0x1   :  { %v17_v0 = vld [vmem:[%s955_s0] sm:$0xff]  ;;  %v18_v1 = vld [vmem:[%s955_s0 + $0x8] sm:$0xff]  ;;  %v19_v4 = vld [vmem:[%s955_s0 + $0x10] sm:$0xff] }
   0x2   :  { %33 = vadd.xlane.f32.xlu0 %v17_v0  ;;  %35 = vadd.xlane.f32.xlu1 %v18_v1  ;;  %v25_v2 = vld [vmem:[%s955_s0 + $0x40] sm:$0xff]  ;;  %v26_v3 = vld [vmem:[%s955_s0 + $0x48] sm:$0xff]  ;;  %v27_v5 = vld [vmem:[%s955_s0 + $0x50] sm:$0xff] }
   0x3   :  { %v654_v6 = vld [vmem:[%s955_s0 + $0x18] sm:$0xff]  ;;  %v666_v8 = vld [vmem:[%s955_s0 + $0x20] sm:$0xff]  ;;  %v678_v10 = vld [vmem:[%s955_s0 + $0x28] sm:$0xff] }
   0x4   :  { %v659_v7 = vld [vmem:[%s955_s0 + $0x58] sm:$0xff]  ;;  %v671_v9 = vld [vmem:[%s955_s0 + $0x60] sm:$0xff]  ;;  %v683_v11 = vld [vmem:[%s955_s0 + $0x68] sm:$0xff] }
   0x5   :  { %v690_v12 = vld [vmem:[%s955_s0 + $0x30] sm:$0xff]  ;;  %v702_v14 = vld [vmem:[%s955_s0 + $0x38] sm:$0xff]  ;;  %v256_v16 = vld [vmem:[%s956_s3] sm:$0xff] }
   0x6   :  { %49 = vadd.xlane.f32.xlu0 %v25_v2  ;;  %51 = vadd.xlane.f32.xlu1 %v26_v3  ;;  %v695_v13 = vld [vmem:[%s955_s0 + $0x70] sm:$0xff]  ;;  %v707_v15 = vld [vmem:[%s955_s0 + $0x78] sm:$0xff]  ;;  %v257_v17 = vld [vmem:[%s956_s3 + $0x8] sm:$0xff] }
   0x7   :  { %v258_v18 = vld [vmem:[%s956_s3 + $0x10] sm:$0xff]  ;;  %v528_v19 = vpack.c.bf16 %v257_v17, %v256_v16  ;;  %v259_v20 = vld [vmem:[%s956_s3 + $0x18] sm:$0xff]  ;;  %v260_v60 = vld [vmem:[%s956_s3 + $0x20] sm:$0xff] }
   0x8   :  { %v532_v21 = vpack.c.bf16 %v259_v20, %v258_v18  ;;  %v261_v61 = vld [vmem:[%s956_s3 + $0x28] sm:$0xff] }
   0x9   :  { %529 = vmatprep.subr.bf16.mxu0 %v528_v19  ;;  %560 = vmatprep.subr.bf16.mxu1 %v528_v19 }
   0xa   :  { %37 = vadd.xlane.f32.xlu0 %v19_v4  ;;  %53 = vadd.xlane.f32.xlu1 %v27_v5 }
   0xb   :  { %531 = vmatpush3.bf16.msra.mxu0 %v528_v19  ;;  %568 = vmatpush3.bf16.msra.mxu1 %v528_v19 }
   0xc   :  { %533 = vmatprep.subr.bf16.mxu0 %v532_v21  ;;  %561 = vmatprep.subr.bf16.mxu1 %v532_v21 }
   0xe   :  { %39 = vadd.xlane.f32.xlu0 %v654_v6  ;;  %55 = vadd.xlane.f32.xlu1 %v659_v7 }
   0xf   :  { %535 = vmatpush3.bf16.msra.mxu0 %v532_v21  ;;  %569 = vmatpush3.bf16.msra.mxu1 %v532_v21 }
  0x12   :  { %41 = vadd.xlane.f32.xlu0 %v666_v8  ;;  %57 = vadd.xlane.f32.xlu1 %v671_v9 }
  0x16   :  { %43 = vadd.xlane.f32.xlu0 %v678_v10  ;;  %59 = vadd.xlane.f32.xlu1 %v683_v11 }
  0x1a   :  { %45 = vadd.xlane.f32.xlu0 %v690_v12  ;;  %61 = vadd.xlane.f32.xlu1 %v695_v13 }
  0x1e   :  { %47 = vadd.xlane.f32.xlu0 %v702_v14  ;;  %63 = vadd.xlane.f32.xlu1 %v707_v15 }
  0x8f   :  { %v34_v22 = vpop.xlane.xlu0 %33  ;;  %v36_v23 = vpop.xlane.xlu1 %35 }
  0x90   :  { %v66_v24 = vmul.f32 0.0078125, %v34_v22  ;;  %v67_v25 = vmul.f32 0.0078125, %v36_v23 }
  0x92   :  { %v723_v26 = vsub.f32 %v17_v0, %v66_v24  ;;  %v725_v27 = vsub.f32 %v18_v1, %v67_v25  ;;  %v536_v0 = vpack.c.bf16 %v261_v61, %v260_v60  ;;  %v264_v24 = vld [vmem:[%s956_s3 + $0x40] sm:$0xff] }
  0x93   :  { %v50_v28 = vpop.xlane.xlu0 %49  ;;  %v52_v29 = vpop.xlane.xlu1 %51 }
  0x94   :  { %v74_v30 = vmul.f32 0.0078125, %v50_v28  ;;  %v98_v31 = vmul.f32 %v723_v26, %v723_v26  ;;  %v75_v32 = vmul.f32 0.0078125, %v52_v29  ;;  %v99_v35 = vmul.f32 %v725_v27, %v725_v27  ;;  %537 = vmatprep.subr.bf16.mxu0 %v536_v0  ;;  %562 = vmatprep.subr.bf16.mxu1 %v536_v0 }
  0x95   :  { %539 = vmatpush3.bf16.msra.mxu0 %v536_v0  ;;  %570 = vmatpush3.bf16.msra.mxu1 %v536_v0 }
  0x96   :  { %v729_v33 = vsub.f32 %v25_v2, %v74_v30  ;;  %114 = vadd.xlane.f32.xlu0 %v98_v31  ;;  %v731_v34 = vsub.f32 %v26_v3, %v75_v32 }
  0x97   :  { %v38_v36 = vpop.xlane.xlu0 %37  ;;  %v54_v37 = vpop.xlane.xlu1 %53 }
  0x98   :  { %v68_v38 = vmul.f32 0.0078125, %v38_v36  ;;  %v106_v39 = vmul.f32 %v729_v33, %v729_v33  ;;  %v76_v40 = vmul.f32 0.0078125, %v54_v37  ;;  %v107_v43 = vmul.f32 %v731_v34, %v731_v34  ;;  %v267_v36 = vld [vmem:[%s956_s3 + $0x58] sm:$0xff] }
  0x9a   :  { %v737_v41 = vsub.f32 %v19_v4, %v68_v38  ;;  %116 = vadd.xlane.f32.xlu0 %v99_v35  ;;  %130 = vadd.xlane.f32.xlu1 %v106_v39  ;;  %v739_v42 = vsub.f32 %v27_v5, %v76_v40  ;;  %v266_v35 = vld [vmem:[%s956_s3 + $0x50] sm:$0xff]  ;;  %v268_v38 = vld [vmem:[%s956_s3 + $0x60] sm:$0xff]  ;;  %v269_v39 = vld [vmem:[%s956_s3 + $0x68] sm:$0xff] }
  0x9b   :  { %v40_v44 = vpop.xlane.xlu0 %39  ;;  %v56_v45 = vpop.xlane.xlu1 %55  ;;  %v548_v37 = vpack.c.bf16 %v267_v36, %v266_v35  ;;  %v552_v40 = vpack.c.bf16 %v269_v39, %v268_v38 }
  0x9c   :  { %v69_v46 = vmul.f32 0.0078125, %v40_v44  ;;  %v100_v47 = vmul.f32 %v737_v41, %v737_v41  ;;  %v77_v48 = vmul.f32 0.0078125, %v56_v45  ;;  %v108_v51 = vmul.f32 %v739_v42, %v739_v42  ;;  %v271_v44 = vld [vmem:[%s956_s3 + $0x78] sm:$0xff] }
  0x9e   :  { %v746_v49 = vsub.f32 %v654_v6, %v69_v46  ;;  %132 = vadd.xlane.f32.xlu1 %v107_v43  ;;  %118 = vadd.xlane.f32.xlu0 %v100_v47  ;;  %v749_v50 = vsub.f32 %v659_v7, %v77_v48  ;;  %v270_v43 = vld [vmem:[%s956_s3 + $0x70] sm:$0xff] }
  0x9f   :  { %v42_v52 = vpop.xlane.xlu0 %41  ;;  %v58_v53 = vpop.xlane.xlu1 %57  ;;  %v556_v45 = vpack.c.bf16 %v271_v44, %v270_v43 }
  0xa0   :  { %v70_v54 = vmul.f32 0.0078125, %v42_v52  ;;  %v101_v55 = vmul.f32 %v746_v49, %v746_v49  ;;  %v78_v56 = vmul.f32 0.0078125, %v58_v53  ;;  %v109_v59 = vmul.f32 %v749_v50, %v749_v50 }
  0xa2   :  { %v756_v57 = vsub.f32 %v666_v8, %v70_v54  ;;  %134 = vadd.xlane.f32.xlu1 %v108_v51  ;;  %120 = vadd.xlane.f32.xlu0 %v101_v55  ;;  %v759_v58 = vsub.f32 %v671_v9, %v78_v56  ;;  %v262_v9 = vld [vmem:[%s956_s3 + $0x30] sm:$0xff] }
  0xa3   :  { %v44_v62 = vpop.xlane.xlu0 %43  ;;  %v60_v63 = vpop.xlane.xlu1 %59 }
  0xa4   :  { %v71_v1 = vmul.f32 0.0078125, %v44_v62  ;;  %v102_v2 = vmul.f32 %v756_v57, %v756_v57  ;;  %v79_v3 = vmul.f32 0.0078125, %v60_v63  ;;  %v110_v6 = vmul.f32 %v759_v58, %v759_v58 }
  0xa6   :  { %v772_v4 = vsub.f32 %v678_v10, %v71_v1  ;;  %136 = vadd.xlane.f32.xlu1 %v109_v59  ;;  %122 = vadd.xlane.f32.xlu0 %v102_v2  ;;  %v775_v5 = vsub.f32 %v683_v11, %v79_v3  ;;  %v263_v10 = vld [vmem:[%s956_s3 + $0x38] sm:$0xff] }
  0xa7   :  { %v46_v7 = vpop.xlane.xlu0 %45  ;;  %v62_v8 = vpop.xlane.xlu1 %61  ;;  %v540_v18 = vpack.c.bf16 %v263_v10, %v262_v9  ;;  %v836_v10 = vld [vmem:[%s957_s1] ss:$0 sm:$0xff] }
  0xa8   :  { %v72_v16 = vmul.f32 0.0078125, %v46_v7  ;;  %v103_v11 = vmul.f32 %v772_v4, %v772_v4  ;;  %v80_v17 = vmul.f32 0.0078125, %v62_v8  ;;  %v111_v21 = vmul.f32 %v775_v5, %v775_v5 }
  0xa9   :  { %541 = vmatprep.subr.bf16.mxu0 %v540_v18  ;;  %563 = vmatprep.subr.bf16.mxu1 %v540_v18 }
  0xaa   :  { %v788_v19 = vsub.f32 %v690_v12, %v72_v16  ;;  %138 = vadd.xlane.f32.xlu1 %v110_v6  ;;  %124 = vadd.xlane.f32.xlu0 %v103_v11  ;;  %v791_v20 = vsub.f32 %v695_v13, %v80_v17  ;;  %v265_v12 = vld [vmem:[%s956_s3 + $0x48] sm:$0xff] }
  0xab   :  { %v48_v22 = vpop.xlane.xlu0 %47  ;;  %v64_v23 = vpop.xlane.xlu1 %63  ;;  %543 = vmatpush3.bf16.msra.mxu0 %v540_v18  ;;  %571 = vmatpush3.bf16.msra.mxu1 %v540_v18  ;;  %v544_v29 = vpack.c.bf16 %v265_v12, %v264_v24 }
  0xac   :  { %v73_v25 = vmul.f32 0.0078125, %v48_v22  ;;  %v104_v13 = vmul.f32 %v788_v19, %v788_v19  ;;  %v81_v28 = vmul.f32 0.0078125, %v64_v23  ;;  %v112_v32 = vmul.f32 %v791_v20, %v791_v20  ;;  %v842_v22 = vld [vmem:[%s958_s2] ss:$0 sm:$0xff] }
  0xad   :  { %545 = vmatprep.subr.bf16.mxu0 %v544_v29  ;;  %564 = vmatprep.subr.bf16.mxu1 %v544_v29 }
  0xae   :  { %v804_v30 = vsub.f32 %v702_v14, %v73_v25  ;;  %140 = vadd.xlane.f32.xlu1 %v111_v21  ;;  %126 = vadd.xlane.f32.xlu0 %v104_v13  ;;  %v807_v31 = vsub.f32 %v707_v15, %v81_v28 }
  0xaf   :  { %547 = vmatpush3.bf16.msra.mxu0 %v544_v29  ;;  %572 = vmatpush3.bf16.msra.mxu1 %v544_v29 }
  0xb0   :  { %v105_v14 = vmul.f32 %v804_v30, %v804_v30  ;;  %v113_v15 = vmul.f32 %v807_v31, %v807_v31  ;;  %549 = vmatprep.subr.bf16.mxu0 %v548_v37  ;;  %565 = vmatprep.subr.bf16.mxu1 %v548_v37 }
  0xb2   :  { %142 = vadd.xlane.f32.xlu1 %v112_v32  ;;  %128 = vadd.xlane.f32.xlu0 %v105_v14 }
  0xb3   :  { %551 = vmatpush3.bf16.msra.mxu0 %v548_v37  ;;  %573 = vmatpush3.bf16.msra.mxu1 %v548_v37 }
  0xb4   :  { %553 = vmatprep.subr.bf16.mxu0 %v552_v40  ;;  %566 = vmatprep.subr.bf16.mxu1 %v552_v40 }
  0xb6   :  { %144 = vadd.xlane.f32.xlu1 %v113_v15 }
  0xb7   :  { %555 = vmatpush3.bf16.msra.mxu0 %v552_v40  ;;  %574 = vmatpush3.bf16.msra.mxu1 %v552_v40 }
  0xb8   :  { %557 = vmatprep.subr.bf16.mxu0 %v556_v45  ;;  %567 = vmatprep.subr.bf16.mxu1 %v556_v45 }
  0xbb   :  { %559 = vmatpush3.bf16.msra.mxu0 %v556_v45  ;;  %575 = vmatpush3.bf16.msra.mxu1 %v556_v45 }
 0x123   :  { %v115_v46 = vpop.xlane.xlu0 %114 }
 0x124   :  { %v146_v47 = vmul.f32 0.0078125, %v115_v46 }
 0x126   :  { %v162_v48 = vadd.f32 1e-05, %v146_v47 }
 0x127   :  { %v131_v51 = vpop.xlane.xlu1 %130  ;;  %v117_v52 = vpop.xlane.xlu0 %116 }
 0x128   :  { %576 = vrsqrt.f32 %v162_v48  ;;  %v154_v53 = vmul.f32 0.0078125, %v131_v51  ;;  %v147_v54 = vmul.f32 0.0078125, %v117_v52 }
 0x12a   :  { %v170_v55 = vadd.f32 1e-05, %v154_v53  ;;  %v163_v56 = vadd.f32 1e-05, %v147_v54 }
 0x12b   :  { %v133_v59 = vpop.xlane.xlu1 %132  ;;  %v119_v60 = vpop.xlane.xlu0 %118 }
 0x12c   :  { %578 = vrsqrt.f32 %v170_v55  ;;  %v155_v61 = vmul.f32 0.0078125, %v133_v59  ;;  %v148_v62 = vmul.f32 0.0078125, %v119_v60 }
 0x12d   :  { %580 = vrsqrt.f32 %v163_v56 }
 0x12e   :  { %v171_v63 = vadd.f32 1e-05, %v155_v61  ;;  %v164_v0 = vadd.f32 1e-05, %v148_v62 }
 0x12f   :  { %v135_v1 = vpop.xlane.xlu1 %134  ;;  %v121_v2 = vpop.xlane.xlu0 %120 }
 0x130   :  { %582 = vrsqrt.f32 %v171_v63  ;;  %v156_v3 = vmul.f32 0.0078125, %v135_v1  ;;  %v149_v6 = vmul.f32 0.0078125, %v121_v2 }
 0x131   :  { %584 = vrsqrt.f32 %v164_v0 }
 0x132   :  { %v577_v7 = vpop.eup %576  ;;  %v172_v8 = vadd.f32 1e-05, %v156_v3  ;;  %v165_v9 = vadd.f32 1e-05, %v149_v6 }
 0x133   :  { %v137_v16 = vpop.xlane.xlu1 %136  ;;  %v123_v11 = vpop.xlane.xlu0 %122  ;;  %v194_v17 = vmul.f32 %v577_v7, %v723_v26 }
 0x134   :  { %586 = vrsqrt.f32 %v172_v8  ;;  %v157_v18 = vmul.f32 0.0078125, %v137_v16  ;;  %v150_v21 = vmul.f32 0.0078125, %v123_v11 }
 0x135   :  { %588 = vrsqrt.f32 %v165_v9  ;;  %v217_v23 = vmul.f32 %v836_v10, %v194_v17 }
 0x136   :  { %v579_v24 = vpop.eup %578  ;;  %v173_v12 = vadd.f32 1e-05, %v157_v18  ;;  %v166_v25 = vadd.f32 1e-05, %v150_v21 }
 0x137   :  { %v581_v13 = vpop.eup %580  ;;  %v139_v28 = vpop.xlane.xlu1 %138  ;;  %v240_v32 = vadd.f32 %v842_v22, %v217_v23  ;;  %v202_v26 = vmul.f32 %v579_v24, %v729_v33 }
 0x138   :  { %v125_v29 = vpop.xlane.xlu0 %124  ;;  %590 = vrsqrt.f32 %v173_v12  ;;  %v158_v35 = vmul.f32 0.0078125, %v139_v28  ;;  %v195_v14 = vmul.f32 %v581_v13, %v725_v27 }
 0x139   :  { %v151_v36 = vmul.f32 0.0078125, %v125_v29  ;;  %592 = vrsqrt.f32 %v166_v25  ;;  %504 = vmatprep.mubr.f32.mxu0 %v240_v32  ;;  %v225_v37 = vmul.f32 %v836_v10, %v202_v26 }
 0x13a   :  { %v583_v15 = vpop.eup %582  ;;  %v174_v38 = vadd.f32 1e-05, %v158_v35  ;;  %v218_v40 = vmul.f32 %v836_v10, %v195_v14 }
 0x13b   :  { %v167_v39 = vadd.f32 1e-05, %v151_v36  ;;  %v585_v43 = vpop.eup %584  ;;  %v141_v44 = vpop.xlane.xlu1 %140  ;;  %v248_v46 = vadd.f32 %v842_v22, %v225_v37  ;;  %v203_v33 = vmul.f32 %v583_v15, %v731_v34 }
 0x13c   :  { %v127_v45 = vpop.xlane.xlu0 %126  ;;  %594 = vrsqrt.f32 %v174_v38  ;;  %v159_v47 = vmul.f32 0.0078125, %v141_v44  ;;  %v241_v27 = vadd.f32 %v842_v22, %v218_v40  ;;  %v196_v51 = vmul.f32 %v585_v43, %v737_v41 }
 0x13d   :  { %v152_v48 = vmul.f32 0.0078125, %v127_v45  ;;  %596 = vrsqrt.f32 %v167_v39  ;;  %516 = vmatprep.mubr.f32.mxu1 %v248_v46  ;;  %v226_v52 = vmul.f32 %v836_v10, %v203_v33 }
 0x13e   :  { %v587_v53 = vpop.eup %586  ;;  %v175_v54 = vadd.f32 1e-05, %v159_v47  ;;  %505 = vmatmul.mubr.f32.vlgmr.msra.gmra.mrb[0].mxu0 %v241_v27  ;;  %v219_v34 = vmul.f32 %v836_v10, %v196_v51 }
 0x13f   :  { %v168_v55 = vadd.f32 1e-05, %v152_v48  ;;  %v589_v56 = vpop.eup %588  ;;  %v143_v59 = vpop.xlane.xlu1 %142  ;;  %v249_v61 = vadd.f32 %v842_v22, %v226_v52  ;;  %v204_v62 = vmul.f32 %v587_v53, %v739_v42 }
 0x140   :  { %v129_v60 = vpop.xlane.xlu0 %128  ;;  %598 = vrsqrt.f32 %v175_v54  ;;  %v160_v63 = vmul.f32 0.0078125, %v143_v59  ;;  %v197_v41 = vmul.f32 %v589_v56, %v746_v49  ;;  %v242_v1 = vadd.f32 %v842_v22, %v219_v34 }
 0x141   :  { %v153_v0 = vmul.f32 0.0078125, %v129_v60  ;;  %600 = vrsqrt.f32 %v168_v55  ;;  %517 = vmatmul.mubr.f32.vlgmr.msra.gmra.mrb[0].mxu1 %v249_v61  ;;  %v227_v2 = vmul.f32 %v836_v10, %v204_v62 }
 0x142   :  { %v591_v3 = vpop.eup %590  ;;  %v176_v6 = vadd.f32 1e-05, %v160_v63  ;;  %v220_v8 = vmul.f32 %v836_v10, %v197_v41  ;;  %507 = vmatprep.mubr.f32.mxu0 %v242_v1 }
 0x143   :  { %v169_v7 = vadd.f32 1e-05, %v153_v0  ;;  %v593_v9 = vpop.eup %592  ;;  %v145_v16 = vpop.xlane.xlu1 %144  ;;  %v250_v42 = vadd.f32 %v842_v22, %v227_v2  ;;  %v205_v11 = vmul.f32 %v591_v3, %v749_v50 }
 0x144   :  { %602 = vrsqrt.f32 %v176_v6  ;;  %v161_v49 = vmul.f32 0.0078125, %v145_v16  ;;  %v243_v17 = vadd.f32 %v842_v22, %v220_v8  ;;  %v198_v18 = vmul.f32 %v593_v9, %v756_v57 }
 0x145   :  { %604 = vrsqrt.f32 %v169_v7  ;;  %519 = vmatprep.mubr.f32.mxu1 %v250_v42  ;;  %v228_v21 = vmul.f32 %v836_v10, %v205_v11 }
 0x146   :  { %v595_v23 = vpop.eup %594  ;;  %v177_v24 = vadd.f32 1e-05, %v161_v49  ;;  %508 = vmatmul.mubr.f32.gmra.mrb[2].mxu0 %v243_v17  ;;  %v221_v12 = vmul.f32 %v836_v10, %v198_v18 }
 0x147   :  { %v597_v25 = vpop.eup %596  ;;  %v251_v13 = vadd.f32 %v842_v22, %v228_v21  ;;  %v206_v50 = vmul.f32 %v595_v23, %v759_v58 }
 0x148   :  { %606 = vrsqrt.f32 %v177_v24  ;;  %v244_v28 = vadd.f32 %v842_v22, %v221_v12  ;;  %v199_v29 = vmul.f32 %v597_v25, %v772_v4 }
 0x149   :  { %520 = vmatmul.mubr.f32.gmra.mrb[2].mxu1 %v251_v13  ;;  %v229_v57 = vmul.f32 %v836_v10, %v206_v50 }
 0x14a   :  { %v599_v32 = vpop.eup %598  ;;  %510 = vmatprep.mubr.f32.mxu0 %v244_v28  ;;  %v222_v26 = vmul.f32 %v836_v10, %v199_v29 }
 0x14b   :  { %v601_v35 = vpop.eup %600  ;;  %v252_v36 = vadd.f32 %v842_v22, %v229_v57  ;;  %v207_v14 = vmul.f32 %v599_v32, %v775_v5 }
 0x14c   :  { %v245_v37 = vadd.f32 %v842_v22, %v222_v26  ;;  %v200_v58 = vmul.f32 %v601_v35, %v788_v19 }
 0x14d   :  { %522 = vmatprep.mubr.f32.mxu1 %v252_v36  ;;  %v230_v15 = vmul.f32 %v836_v10, %v207_v14 }
 0x14e   :  { %v603_v4 = vpop.eup %602  ;;  %511 = vmatmul.mubr.f32.gmra.mrb[4].mxu0 %v245_v37  ;;  %v223_v38 = vmul.f32 %v836_v10, %v200_v58 }
 0x14f   :  { %v605_v39 = vpop.eup %604  ;;  %v253_v40 = vadd.f32 %v842_v22, %v230_v15  ;;  %v208_v43 = vmul.f32 %v603_v4, %v791_v20 }
 0x150   :  { %v246_v44 = vadd.f32 %v842_v22, %v223_v38  ;;  %v201_v5 = vmul.f32 %v605_v39, %v804_v30 }
 0x151   :  { %523 = vmatmul.mubr.f32.gmra.mrb[4].mxu1 %v253_v40  ;;  %v231_v45 = vmul.f32 %v836_v10, %v208_v43 }
 0x152   :  { %v607_v19 = vpop.eup %606  ;;  %513 = vmatprep.mubr.f32.mxu0 %v246_v44  ;;  %v224_v46 = vmul.f32 %v836_v10, %v201_v5 }
 0x153   :  { %v254_v33 = vadd.f32 %v842_v22, %v231_v45  ;;  %v209_v47 = vmul.f32 %v607_v19, %v807_v31 }
 0x154   :  { %v247_v48 = vadd.f32 %v842_v22, %v224_v46 }
 0x155   :  { %525 = vmatprep.mubr.f32.mxu1 %v254_v33  ;;  %v232_v20 = vmul.f32 %v836_v10, %v209_v47 }
 0x156   :  { %514 = vmatmul.mubr.f32.gmra.mrb[6].mxu0 %v247_v48 }
 0x157   :  { %v255_v27 = vadd.f32 %v842_v22, %v232_v20 }
 0x159   :  { %526 = vmatmul.mubr.f32.gmra.mrb[6].mxu1 %v255_v27 }
 0x211   :  { %v506_v30 = vpop.f32.mrb[0].mxu0 }
 0x212   :  { %419 = vst.msk [vmem:[%s959_s4 + $0x8] sm:$0xff] %vm417_vm0, %v506_v30  ;;  %v338_v51 = vpop.f32.mrb[1].mxu0 }
 0x213   :  { %418 = vst.msk [vmem:[%s959_s4] sm:$0xff] %vm417_vm0, %v338_v51 }
 0x214   :  { %v518_v31 = vpop.f32.mrb[0].mxu1 }
 0x215   :  { %427 = vst.msk [vmem:[%s959_s4 + $0x48] sm:$0xff] %vm417_vm0, %v518_v31  ;;  %v378_v10 = vpop.f32.mrb[1].mxu1 }
 0x216   :  { %426 = vst.msk [vmem:[%s959_s4 + $0x40] sm:$0xff] %vm417_vm0, %v378_v10 }
 0x219   :  { %v509_v22 = vpop.f32.mrb[2].mxu0 }
 0x21a   :  { %421 = vst.msk [vmem:[%s959_s4 + $0x18] sm:$0xff] %vm417_vm0, %v509_v22  ;;  %v348_v52 = vpop.f32.mrb[3].mxu0 }
 0x21b   :  { %420 = vst.msk [vmem:[%s959_s4 + $0x10] sm:$0xff] %vm417_vm0, %v348_v52 }
 0x21c   :  { %v521_v53 = vpop.f32.mrb[2].mxu1 }
 0x21d   :  { %429 = vst.msk [vmem:[%s959_s4 + $0x58] sm:$0xff] %vm417_vm0, %v521_v53  ;;  %v388_v54 = vpop.f32.mrb[3].mxu1 }
 0x21e   :  { %428 = vst.msk [vmem:[%s959_s4 + $0x50] sm:$0xff] %vm417_vm0, %v388_v54 }
 0x221   :  { %v512_v55 = vpop.f32.mrb[4].mxu0 }
 0x222   :  { %423 = vst.msk [vmem:[%s959_s4 + $0x28] sm:$0xff] %vm417_vm0, %v512_v55  ;;  %v358_v56 = vpop.f32.mrb[5].mxu0 }
 0x223   :  { %422 = vst.msk [vmem:[%s959_s4 + $0x20] sm:$0xff] %vm417_vm0, %v358_v56 }
 0x224   :  { %v524_v59 = vpop.f32.mrb[4].mxu1 }
 0x225   :  { %431 = vst.msk [vmem:[%s959_s4 + $0x68] sm:$0xff] %vm417_vm0, %v524_v59  ;;  %v398_v60 = vpop.f32.mrb[5].mxu1 }
 0x226   :  { %430 = vst.msk [vmem:[%s959_s4 + $0x60] sm:$0xff] %vm417_vm0, %v398_v60 }
 0x229   :  { %v515_v34 = vpop.f32.mrb[6].mxu0 }
 0x22a   :  { %425 = vst.msk [vmem:[%s959_s4 + $0x38] sm:$0xff] %vm417_vm0, %v515_v34  ;;  %v368_v61 = vpop.f32.mrb[7].mxu0 }
 0x22b   :  { %424 = vst.msk [vmem:[%s959_s4 + $0x30] sm:$0xff] %vm417_vm0, %v368_v61 }
 0x22c   :  { %v527_v62 = vpop.f32.mrb[6].mxu1 }
 0x22d   :  { %433 = vst.msk [vmem:[%s959_s4 + $0x78] sm:$0xff] %vm417_vm0, %v527_v62  ;;  %v408_v63 = vpop.f32.mrb[7].mxu1 }
 0x22e   :  { %432 = vst.msk [vmem:[%s959_s4 + $0x70] sm:$0xff] %vm417_vm0, %v408_v63 }

</bundles_post_ra>
